<compile_context>
chip_gen: v6e
topology: v6e:2x2x1
jax: 0.10.0
libtpu: 0.0.40
codegen_flags: <defaults>
</compile_context>

<pallas_src>
import functools

import jax
import jax.numpy as jnp
from jax.experimental import pallas as pl
from jax.experimental.pallas import tpu as pltpu


def _attention_kernel(inp_ref, src_ref, bias_ref, w_in_t_ref, w_ctx_ref, w_inp_ref,
                      out_ref, attn_ref):
    # Per-block shapes (block over batch):
    #   inp_ref    : (bb, D_in)      bf16
    #   src_ref    : (bb, S, D_src)  bf16   (batch-major; lanes = D)
    #   bias_ref   : (bb, S)         f32    additive mask (0 valid, -inf padded)
    #   w_in_t_ref : (D_in, D_src)   bf16
    #   w_ctx_ref  : (D_src, D_out)  bf16
    #   w_inp_ref  : (D_in, D_out)   bf16
    #   out_ref    : (bb, D_out)     f32
    #   attn_ref   : (bb, S)         f32
    inp = inp_ref[...]                                   # bf16
    src = src_ref[...].astype(jnp.float32)               # elementwise math in f32 (v5e-safe)

    # input projection -> MXU, bf16 operands, f32 accumulation.
    x = jnp.dot(inp, w_in_t_ref[...], preferred_element_type=jnp.float32)   # (bb, D_src)

    # attention scores: contraction over D.
    # TODO(synk): at large D route this contraction through the MXU; a batched
    # matvec dot_general (no rhs free dim) is not reliably lowerable in Mosaic,
    # so the known-good elementwise + reduce form is kept here.
    scores = jnp.sum(src * x[:, None, :], axis=2)        # (bb, S) f32
    scores = scores + bias_ref[...]                      # additive -inf mask == masked_fill

    # masked softmax over the source axis (last / lane axis in this layout).
    m = jnp.max(scores, axis=-1, keepdims=True)
    e = jnp.exp(scores - m)
    denom = jnp.sum(e, axis=-1, keepdims=True)
    attn = e * pl.reciprocal(denom, approx=True)         # EUP reciprocal (free slot)
    attn_ref[...] = attn

    # context: contraction over S = middle axis -> cheap cross-vreg VPU accumulation.
    ctx = jnp.sum(attn[:, :, None] * src, axis=1)        # (bb, D_src) f32

    # output projection + tanh; concat folded into two matmuls on the pre-split weight.
    h = (jnp.dot(ctx.astype(jnp.bfloat16), w_ctx_ref[...],
                 preferred_element_type=jnp.float32)
         + jnp.dot(inp, w_inp_ref[...], preferred_element_type=jnp.float32))
    out_ref[...] = jnp.tanh(h)


def prepare_attention_params(w_in, w_out, d_src):
    """Hoisted one-time weight prep: transpose, split the concat weight, cast to bf16.

    w_in : (D_src, D_in)          PyTorch Linear layout (out, in)
    w_out: (D_out, D_src + D_in)
    """
    w_in_t = jnp.transpose(w_in).astype(jnp.bfloat16)      # (D_in, D_src)
    w_out_t = jnp.transpose(w_out)                         # (D_src + D_in, D_out)
    w_ctx = w_out_t[:d_src, :].astype(jnp.bfloat16)        # applied to ctx half of concat
    w_inp = w_out_t[d_src:, :].astype(jnp.bfloat16)        # applied to input half of concat
    return w_in_t, w_ctx, w_inp


@jax.jit
def attention_layer(inp, src, pad_mask, w_in_t, w_ctx, w_inp):
    """inp: (B, D_in) f32, src: (S, B, D_src) f32, pad_mask: (S, B) bool or None.
    Weights come from prepare_attention_params. Returns (out (B, D_out), attn (S, B))."""
    S, B, D_src = src.shape
    _, D_in = inp.shape
    D_out = w_ctx.shape[1]

    # Layout plumbing (wrapper-side): batch-major bf16 src, additive mask bias, bf16 inp.
    src_bsd = jnp.transpose(src, (1, 0, 2)).astype(jnp.bfloat16)     # (B, S, D_src)
    if pad_mask is None:
        bias = jnp.zeros((B, S), jnp.float32)
    else:
        bias = jnp.where(jnp.transpose(pad_mask), -jnp.inf, 0.0).astype(jnp.float32)
    inp_bf = inp.astype(jnp.bfloat16)

    bb = min(B, 128)                      # batch block; grid=(1,) at small B
    assert B % bb == 0, "batch must be divisible by the batch block"
    grid = (B // bb,)

    batch_blk = lambda i: (i, 0)
    full_blk = lambda i: (0, 0)

    out, attn_bs = pl.pallas_call(
        _attention_kernel,
        out_shape=(
            jax.ShapeDtypeStruct((B, D_out), jnp.float32),
            jax.ShapeDtypeStruct((B, S), jnp.float32),
        ),
        grid_spec=pltpu.PrefetchScalarGridSpec(
            num_scalar_prefetch=0,
            grid=grid,
            in_specs=[
                pl.BlockSpec((bb, D_in), batch_blk),                # inp (bf16)
                pl.BlockSpec((bb, S, D_src), lambda i: (i, 0, 0)),  # src (bf16, batch-major)
                pl.BlockSpec((bb, S), batch_blk),                   # additive mask bias (f32)
                pl.BlockSpec((D_in, D_src), full_blk),              # W_in^T (bf16)
                pl.BlockSpec((D_src, D_out), full_blk),             # W_out ctx half (bf16)
                pl.BlockSpec((D_in, D_out), full_blk),              # W_out input half (bf16)
            ],
            out_specs=(
                pl.BlockSpec((bb, D_out), batch_blk),
                pl.BlockSpec((bb, S), batch_blk),                   # attn, lane-dense in S
            ),
        ),
        compiler_params=pltpu.CompilerParams(
            # Batch blocks are independent: shards across v7x's 2 TensorCores,
            # no-op on v5e/v6e.  (At scale: block S as a trailing "arbitrary"
            # axis with an online softmax and re-derive tiles for 64 MiB VMEM.)
            dimension_semantics=("parallel",),
        ),
    )(inp_bf, src_bsd, bias, w_in_t, w_ctx, w_inp)

    # Return attn in the PyTorch (S, B) convention.
    return out, jnp.transpose(attn_bs)


if __name__ == "__main__":
    # Small shapes consistent with the module's forward contract.
    S, B = 8, 8                  # source length, batch
    D_in, D_src, D_out = 32, 32, 32

    key = jax.random.PRNGKey(0)
    k1, k2, k3, k4 = jax.random.split(key, 4)

    # Deterministic params mirroring Linear(): uniform(-0.1, 0.1), bias=False.
    w_in = jax.random.uniform(k1, (D_src, D_in), jnp.float32, -0.1, 0.1)
    w_out = jax.random.uniform(k2, (D_out, D_in + D_src), jnp.float32, -0.1, 0.1)

    inp = jax.random.normal(k3, (B, D_in), jnp.float32)
    src = jax.random.normal(k4, (S, B, D_src), jnp.float32)

    # Padding mask: pad last two source positions of batch 0, last one of batch 1.
    pad_mask = jnp.zeros((S, B), jnp.bool_)
    pad_mask = pad_mask.at[S - 2:, 0].set(True)
    pad_mask = pad_mask.at[S - 1:, 1].set(True)

    w_in_t, w_ctx, w_inp = prepare_attention_params(w_in, w_out, D_src)
    out, attn = attention_layer(inp, src, pad_mask, w_in_t, w_ctx, w_inp)
    jax.block_until_ready((out, attn))

    # Pure-JAX reference with the same bf16 input/weight quantization
    # (matmuls accumulate in f32, matching the kernel's MXU path).
    f32 = jnp.float32
    inp_q = inp.astype(jnp.bfloat16).astype(f32)
    src_q = src.astype(jnp.bfloat16).astype(f32)
    w_in_q = w_in.astype(jnp.bfloat16).astype(f32)
    w_out_q = w_out.astype(jnp.bfloat16).astype(f32)

    x_ref = inp_q @ w_in_q.T
    scores_ref = jnp.sum(src_q * x_ref[None], axis=2)
    scores_ref = jnp.where(pad_mask, -jnp.inf, scores_ref)
    attn_ref = jax.nn.softmax(scores_ref, axis=0)
    ctx_ref = jnp.sum(attn_ref[:, :, None] * src_q, axis=0)
    ctx_ref_q = ctx_ref.astype(jnp.bfloat16).astype(f32)
    out_ref = jnp.tanh(jnp.concatenate([ctx_ref_q, inp_q], axis=1) @ w_out_q.T)

    assert out.shape == (B, D_out) and attn.shape == (S, B)
    assert jnp.allclose(attn, attn_ref, atol=1e-2), "attn mismatch"
    assert jnp.allclose(out, out_ref, atol=1e-2), "output mismatch"
    print("KERNEL_OK")
</pallas_src>

<mosaic_0001>
module attributes {stable_mosaic.version = 11 : i64} {
  func.func @_attention_kernel(%arg0: i32, %arg1: memref<8x32xbf16, #tpu.memory_space<vmem>>, %arg2: memref<8x8x32xbf16, #tpu.memory_space<vmem>>, %arg3: memref<8x8xf32, #tpu.memory_space<vmem>>, %arg4: memref<32x32xbf16, #tpu.memory_space<vmem>>, %arg5: memref<32x32xbf16, #tpu.memory_space<vmem>>, %arg6: memref<32x32xbf16, #tpu.memory_space<vmem>>, %arg7: memref<8x32xf32, #tpu.memory_space<vmem>>, %arg8: memref<8x8xf32, #tpu.memory_space<vmem>>) attributes {dimension_semantics = [#tpu.dimension_semantics<parallel>], iteration_bounds = array<i64: 1>, scalar_prefetch = 0 : i64, scratch_operands = 0 : i64, tpu.core_type = #tpu.core_type<tc>, window_params = [{transform_indices = @transform_0, window_bounds = array<i64: 8, 32>}, {transform_indices = @transform_1, window_bounds = array<i64: 8, 8, 32>}, {transform_indices = @transform_2, window_bounds = array<i64: 8, 8>}, {pipeline_mode = #tpu.pipeline_mode<synchronous>, transform_indices = @transform_3, window_bounds = array<i64: 32, 32>}, {pipeline_mode = #tpu.pipeline_mode<synchronous>, transform_indices = @transform_4, window_bounds = array<i64: 32, 32>}, {pipeline_mode = #tpu.pipeline_mode<synchronous>, transform_indices = @transform_5, window_bounds = array<i64: 32, 32>}, {transform_indices = @transform_6, window_bounds = array<i64: 8, 32>}, {transform_indices = @transform_7, window_bounds = array<i64: 8, 8>}]} {
    %c0 = arith.constant 0 : index
    %c0_0 = arith.constant 0 : index
    %0 = vector.load %arg1[%c0, %c0_0] : memref<8x32xbf16, #tpu.memory_space<vmem>>, vector<8x32xbf16>
    %c0_1 = arith.constant 0 : index
    %c0_2 = arith.constant 0 : index
    %c0_3 = arith.constant 0 : index
    %1 = vector.load %arg2[%c0_1, %c0_2, %c0_3] : memref<8x8x32xbf16, #tpu.memory_space<vmem>>, vector<8x8x32xbf16>
    %2 = arith.extf %1 : vector<8x8x32xbf16> to vector<8x8x32xf32>
    %c0_4 = arith.constant 0 : index
    %c0_5 = arith.constant 0 : index
    %3 = vector.load %arg4[%c0_4, %c0_5] : memref<32x32xbf16, #tpu.memory_space<vmem>>, vector<32x32xbf16>
    %cst = arith.constant dense<0.000000e+00> : vector<8x32xf32>
    %4 = tpu.matmul %0, %3, %cst {dimension_numbers = #tpu.dot_dimension_numbers<[1], [0], [0], [1], [0, 0, 1, 1], [], []>} : vector<8x32xbf16>, vector<32x32xbf16>, vector<8x32xf32> -> vector<8x32xf32>
    %5 = vector.shape_cast %4 : vector<8x32xf32> to vector<8x1x32xf32>
    %6 = vector.broadcast %5 : vector<8x1x32xf32> to vector<8x8x32xf32>
    %7 = arith.mulf %2, %6 : vector<8x8x32xf32>
    %cst_6 = arith.constant dense<0.000000e+00> : vector<8x8xf32>
    %8 = vector.multi_reduction <add>, %7, %cst_6 [2] : vector<8x8x32xf32> to vector<8x8xf32>
    %c0_7 = arith.constant 0 : index
    %c0_8 = arith.constant 0 : index
    %9 = vector.load %arg3[%c0_7, %c0_8] : memref<8x8xf32, #tpu.memory_space<vmem>>, vector<8x8xf32>
    %10 = arith.addf %8, %9 : vector<8x8xf32>
    %cst_9 = arith.constant dense<0xFF800000> : vector<8xf32>
    %11 = vector.multi_reduction <maximumf>, %10, %cst_9 [1] : vector<8x8xf32> to vector<8xf32>
    %12 = vector.shape_cast %11 : vector<8xf32> to vector<8x1xf32>
    %13 = vector.broadcast %12 : vector<8x1xf32> to vector<8x8xf32>
    %14 = arith.subf %10, %13 : vector<8x8xf32>
    %15 = math.exp %14 : vector<8x8xf32>
    %cst_10 = arith.constant dense<0.000000e+00> : vector<8xf32>
    %16 = vector.multi_reduction <add>, %15, %cst_10 [1] : vector<8x8xf32> to vector<8xf32>
    %17 = vector.shape_cast %16 : vector<8xf32> to vector<8x1xf32>
    %18 = tpu.reciprocal %17 {approx = true} : vector<8x1xf32> -> vector<8x1xf32>
    %19 = vector.broadcast %18 : vector<8x1xf32> to vector<8x8xf32>
    %20 = arith.mulf %15, %19 : vector<8x8xf32>
    %c0_11 = arith.constant 0 : index
    %c0_12 = arith.constant 0 : index
    %21 = vector.load %arg8[%c0_11, %c0_12] : memref<8x8xf32, #tpu.memory_space<vmem>>, vector<8x8xf32>
    tpu.vector_store %arg8[%c0_11, %c0_12], %20 {strides = array<i32>} : memref<8x8xf32, #tpu.memory_space<vmem>>, vector<8x8xf32>,
    %22 = vector.shape_cast %20 : vector<8x8xf32> to vector<8x8x1xf32>
    %23 = vector.broadcast %22 : vector<8x8x1xf32> to vector<8x8x32xf32>
    %24 = arith.mulf %23, %2 : vector<8x8x32xf32>
    %cst_13 = arith.constant dense<0.000000e+00> : vector<8x32xf32>
    %25 = vector.multi_reduction <add>, %24, %cst_13 [1] : vector<8x8x32xf32> to vector<8x32xf32>
    %26 = arith.truncf %25 : vector<8x32xf32> to vector<8x32xbf16>
    %c0_14 = arith.constant 0 : index
    %c0_15 = arith.constant 0 : index
    %27 = vector.load %arg5[%c0_14, %c0_15] : memref<32x32xbf16, #tpu.memory_space<vmem>>, vector<32x32xbf16>
    %cst_16 = arith.constant dense<0.000000e+00> : vector<8x32xf32>
    %28 = tpu.matmul %26, %27, %cst_16 {dimension_numbers = #tpu.dot_dimension_numbers<[1], [0], [0], [1], [0, 0, 1, 1], [], []>} : vector<8x32xbf16>, vector<32x32xbf16>, vector<8x32xf32> -> vector<8x32xf32>
    %c0_17 = arith.constant 0 : index
    %c0_18 = arith.constant 0 : index
    %29 = vector.load %arg6[%c0_17, %c0_18] : memref<32x32xbf16, #tpu.memory_space<vmem>>, vector<32x32xbf16>
    %cst_19 = arith.constant dense<0.000000e+00> : vector<8x32xf32>
    %30 = tpu.matmul %0, %29, %cst_19 {dimension_numbers = #tpu.dot_dimension_numbers<[1], [0], [0], [1], [0, 0, 1, 1], [], []>} : vector<8x32xbf16>, vector<32x32xbf16>, vector<8x32xf32> -> vector<8x32xf32>
    %31 = arith.addf %28, %30 : vector<8x32xf32>
    %32 = math.tanh %31 : vector<8x32xf32>
    %c0_20 = arith.constant 0 : index
    %c0_21 = arith.constant 0 : index
    %33 = vector.load %arg7[%c0_20, %c0_21] : memref<8x32xf32, #tpu.memory_space<vmem>>, vector<8x32xf32>
    tpu.vector_store %arg7[%c0_20, %c0_21], %32 {strides = array<i32>} : memref<8x32xf32, #tpu.memory_space<vmem>>, vector<8x32xf32>,
    return
  }
  func.func @transform_0(%arg0: i32) -> (i32, i32) {
    %c0_i32 = arith.constant 0 : i32
    %c0_i32_0 = arith.constant 0 : i32
    return %arg0, %c0_i32 : i32, i32
  }
  func.func @transform_1(%arg0: i32) -> (i32, i32, i32) {
    %c0_i32 = arith.constant 0 : i32
    %c0_i32_0 = arith.constant 0 : i32
    %c0_i32_1 = arith.constant 0 : i32
    return %arg0, %c0_i32, %c0_i32_0 : i32, i32, i32
  }
  func.func @transform_2(%arg0: i32) -> (i32, i32) {
    %c0_i32 = arith.constant 0 : i32
    %c0_i32_0 = arith.constant 0 : i32
    return %arg0, %c0_i32 : i32, i32
  }
  func.func @transform_3(%arg0: i32) -> (i32, i32) {
    %c0_i32 = arith.constant 0 : i32
    %c0_i32_0 = arith.constant 0 : i32
    %c0_i32_1 = arith.constant 0 : i32
    return %c0_i32, %c0_i32_0 : i32, i32
  }
  func.func @transform_4(%arg0: i32) -> (i32, i32) {
    %c0_i32 = arith.constant 0 : i32
    %c0_i32_0 = arith.constant 0 : i32
    %c0_i32_1 = arith.constant 0 : i32
    return %c0_i32, %c0_i32_0 : i32, i32
  }
  func.func @transform_5(%arg0: i32) -> (i32, i32) {
    %c0_i32 = arith.constant 0 : i32
    %c0_i32_0 = arith.constant 0 : i32
    %c0_i32_1 = arith.constant 0 : i32
    return %c0_i32, %c0_i32_0 : i32, i32
  }
  func.func @transform_6(%arg0: i32) -> (i32, i32) {
    %c0_i32 = arith.constant 0 : i32
    %c0_i32_0 = arith.constant 0 : i32
    return %arg0, %c0_i32 : i32, i32
  }
  func.func @transform_7(%arg0: i32) -> (i32, i32) {
    %c0_i32 = arith.constant 0 : i32
    %c0_i32_0 = arith.constant 0 : i32
    return %arg0, %c0_i32 : i32, i32
  }
}

</mosaic_0001>

<bundles_post_ra>
// kernel: attention_layer.1
= control target key start
LH: loop header
LB: loop body
LE: loop exit
PB: predicated region body
PF: predicated region fallthrough
CT: control target
= control target key end

     0   :  { %v109_v1 = vlaneseq  ;;  %v1003_v2 = vmov 0.0   ;;  %vm1004_vm0 = vmmov 0   ;;  %vm60_vm1 = vcmask 261120   ;;  %s1323_s0 = inlined_call_operand.vmem [shape: bf16[8,32], index: 0, kind: input, shape index: {}]   ;;  %s1324_s1 = inlined_call_operand.vmem [shape: bf16[8,8,32], index: 1, kind: input, shape index: {}]   ;;  %s1325_s2 = inlined_call_operand.vmem [shape: f32[8,8], index: 2, kind: input, shape index: {}]   ;;  %s1326_s3 = inlined_call_operand.vmem [shape: bf16[32,32], index: 3, kind: input, shape index: {}]   ;;  %s1327_s4 = inlined_call_operand.vmem [shape: bf16[32,32], index: 4, kind: input, shape index: {}]   ;;  %s1328_s5 = inlined_call_operand.vmem [shape: bf16[32,32], index: 5, kind: input, shape index: {}]   ;;  %s1329_s6 = inlined_call_operand.hbm [shape: f32[8,32], index: 6, kind: output, shape index: {0}]   ;;  %s1330_s7 = inlined_call_operand.vmem [shape: f32[8,8], index: 7, kind: output, shape index: {1}]  }
   0x1   :  { %v955_v0 = vld [vmem:[%s1326_s3 + $0x8] sm:$0xff]   ;;  %924 = vmatprep.subr.bf16.mxu0 %v1003_v2  ;;  %932 = vmatprep.subr.bf16.mxu1 %v1003_v2  ;;  %v956_v3 = vld [vmem:[%s1326_s3] sm:$0xff]  }
   0x2   :  { %925 = vmatpush3.bf16.msra.mxu0 %v955_v0  ;;  %928 = vmatprep.mubr.msk.bf16.mxu0 %vm1004_vm0, %v1003_v2  ;;  %v1059_v4 = vshrl.u32 %v109_v1, 7  ;;  %v1064_v5 = vld [vmem:[%s1325_s2] sm:$0xff] }
   0x3   :  { %926 = vmatprep.subr.bf16.mxu0 %v1003_v2  ;;  %936 = vmatprep.mubr.msk.bf16.mxu1 %vm1004_vm0, %v1003_v2  ;;  %v1072_v6 = vld [vmem:[%s1323_s0] sm:$0xf] }
   0x4   :  { %v1075_v7 = vsub.s32 1, %v1059_v4  ;;  %v1078_v8 = vsub.s32 2, %v1059_v4  ;;  %v1081_v9 = vsub.s32 0, %v1059_v4  ;;  %v1084_v10 = vsub.s32 4, %v1059_v4 }
   0x6   :  { %927 = vmatpush3.bf16.msra.mxu0 %v956_v3  ;;  %v238_v11 = vrot.slane %v1064_v5, %v1075_v7  ;;  %v231_v12 = vrot.slane %v1064_v5, %v1081_v9 }
   0x7   :  { %940 = vmatprep.subr.bf16.mxu0 %v1003_v2 }
   0x8   :  { %13 = vsyncpa [#allocation3], 0  ;;  %240 = vbcast.lane.b32.xlu1 %v238_v11, 256  ;;  %v245_v13 = vrot.slane %v1064_v5, %v1078_v8  ;;  %v1094_v14 = vsub.s32 3, %v1059_v4  ;;  %233 = vbcast.lane.b32.xlu0 %v231_v12, 256  ;;  %v259_v15 = vrot.slane %v1064_v5, %v1084_v10  ;;  %v1105_v17 = vsub.s32 5, %v1059_v4 }
   0x9   :  { %929 = vmatmul.mubr.msk.bf16.vlgmr.msra.gmra.mxu0 %vm60_vm1, %v1072_v6  ;;  %v1005_v19 = vmov 1966171168   ;;  %v1113_v26 = vld [vmem:[%s1324_s1] sm:$0xff]   ;;  %v1118_v28 = vld [vmem:[%s1324_s1 + $0x8] sm:$0xff]   ;;  %v1127_v42 = vld [vmem:[%s1324_s1 + $0x10] sm:$0xff]   ;;  %vm366_vm2 = vcmask 1041409  }
   0xa   :  { %944 = vmatprep.mubr.msk.bf16.mxu0 %vm1004_vm0, %v1003_v2  ;;  %v252_v16 = vrot.slane %v1064_v5, %v1094_v14  ;;  %v266_v18 = vrot.slane %v1064_v5, %v1105_v17  ;;  %v107_v20 = vunpack.c.l.s4 %v1005_v19  ;;  %v898_v33 = vunpack.c.l.bf16 %v1113_v26  ;;  %v1150_v60 = vld [vmem:[%s1324_s1 + $0x18] sm:$0xff]  }
   0xb   :  { %v902_v37 = vunpack.c.l.bf16 %v1118_v28  ;;  %v899_v41 = vunpack.c.h.bf16 %v1113_v26  ;;  %v903_v45 = vunpack.c.h.bf16 %v1118_v28  ;;  %v906_v51 = vunpack.c.l.bf16 %v1127_v42 }
   0xc   :  { %247 = vbcast.lane.b32.xlu1 %v245_v13, 256  ;;  %261 = vbcast.lane.b32.xlu0 %v259_v15, 256  ;;  %v108_v21 = vunpack.c.0.s8 %v107_v20  ;;  %v907_v52 = vunpack.c.h.bf16 %v1127_v42  ;;  %v910_v0 = vunpack.c.l.bf16 %v1150_v60  ;;  %v911_v13 = vunpack.c.h.bf16 %v1150_v60 }
   0xd   :  { %vm368_vm3 = vcmask 1042434   ;;  %vm370_vm4 = vcmask 1043459   ;;  %vm372_vm5 = vcmask 1044484   ;;  %vm374_vm6 = vcmask 1045509  }
   0xe   :  { %v111_v22 = vsub.s32 %v108_v21, %v1059_v4  ;;  %vm376_vm7 = vcmask 1046534   ;;  %vm378_vm8 = vcmask 1047559   ;;  %vm381_vm9 = vcmask 64512  }
  0x10   :  { %254 = vbcast.lane.b32.xlu1 %v252_v16, 256 }
  0x14   :  { %268 = vbcast.lane.b32.xlu1 %v266_v18, 256 }
  0xc9   :  { %v98_v23 = vpop.f32.mrf.mxu0 }
  0xca   :  { %v105_v24 = vcombine.high %v98_v23, %v98_v23  ;;  %v112_v25 = vrot.slane %v98_v23, %v111_v22 }
  0xcb   :  { %v930_v27 = vpop.f32.mrf.mxu0 }
  0xcc   :  { %v119_v29 = vrot.slane %v105_v24, %v111_v22  ;;  %v120_v30 = vcombine.high %v112_v25, %v112_v25  ;;  %v128_v31 = vrot.slane %v112_v25, %v111_v22  ;;  %v1171_v24 = vsub.s32 7, %v1059_v4 }
  0xcd   :  { %v101_v32 = vpop.f32.mrf.mxu0  ;;  %v1174_v25 = vsub.s32 6, %v1059_v4 }
  0xce   :  { %v121_v34 = vcombine.high %v119_v29, %v119_v29  ;;  %v142_v35 = vrot.slane %v120_v30, %v111_v22  ;;  %v150_v36 = vcombine.high %v128_v31, %v128_v31  ;;  %v135_v38 = vrot.slane %v119_v29, %v111_v22  ;;  %v241_v30 = vpop.permute.xlu1 %240  ;;  %v234_v32 = vpop.permute.xlu0 %233 }
  0xcf   :  { %v931_v39 = vpop.f32.mrf.mxu0  ;;  %v157_v40 = vrot.slane %v128_v31, %v1081_v9  ;;  %v280_v27 = vrot.slane %v1064_v5, %v1171_v24  ;;  %v273_v29 = vrot.slane %v1064_v5, %v1174_v25 }
  0xd0   :  { %v165_v43 = vrot.slane %v150_v36, %v1081_v9  ;;  %v161_v44 = vrot.slane %v142_v35, %v1081_v9  ;;  %v152_v46 = vcombine.high %v142_v35, %v142_v35  ;;  %v149_v48 = vrot.slane %v121_v34, %v111_v22 }
  0xd1   :  { %v194_v47 = vmul.f32 %v898_v33, %v157_v40  ;;  %v173_v55 = vrot.slane %v135_v38, %v1081_v9  ;;  %v151_v56 = vcombine.high %v135_v38, %v135_v38  ;;  %v1006_v22 = vmov 0  }
  0xd2   :  { %v196_v49 = vmul.f32 %v902_v37, %v165_v43  ;;  %v169_v50 = vrot.slane %v152_v46, %v1081_v9  ;;  %v195_v54 = vmul.f32 %v899_v41, %v161_v44  ;;  %v177_v59 = vrot.slane %v149_v48, %v1081_v9  ;;  %953 = vset.pattern.permute.xlu0 %v1006_v22  ;;  %v248_v31 = vpop.permute.xlu1 %247  ;;  %v262_v35 = vpop.permute.xlu0 %261 }
  0xd3   :  { %v202_v53 = vsel %vm60_vm1, %v194_v47, 0.0  ;;  %v153_v61 = vcombine.high %v149_v48, %v149_v48  ;;  %v198_v63 = vmul.f32 %v906_v51, %v173_v55  ;;  %v181_v3 = vrot.slane %v151_v56, %v1081_v9  ;;  %954 = vset.pattern.permute.xlu1 %v1006_v22 }
  0xd4   :  { %203 = vadd.xlane.f32.xlu0 %v202_v53  ;;  %v208_v57 = vsel %vm60_vm1, %v196_v49, 0.0  ;;  %v197_v58 = vmul.f32 %v903_v45, %v169_v50  ;;  %v205_v62 = vsel %vm60_vm1, %v195_v54, 0.0  ;;  %v199_v12 = vmul.f32 %v907_v52, %v177_v59 }
  0xd5   :  { %209 = vadd.xlane.f32.xlu1 %v208_v57  ;;  %v185_v15 = vrot.slane %v153_v61, %v1081_v9  ;;  %v214_v16 = vsel %vm60_vm1, %v198_v63, 0.0  ;;  %v200_v18 = vmul.f32 %v910_v0, %v181_v3  ;;  %v333_v61 = vand.u32 127, %v109_v1 }
  0xd6   :  { %v211_v11 = vsel %vm60_vm1, %v197_v58, 0.0  ;;  %v217_v19 = vsel %vm60_vm1, %v199_v12, 0.0  ;;  %v255_v34 = vpop.permute.xlu1 %254 }
  0xd7   :  { %v201_v20 = vmul.f32 %v911_v13, %v185_v15  ;;  %v220_v21 = vsel %vm60_vm1, %v200_v18, 0.0  ;;  %v1197_v63 = vsub.s32 %v333_v61, %v1059_v4 }
  0xd8   :  { %206 = vadd.xlane.f32.xlu0 %v205_v62 }
  0xd9   :  { %212 = vadd.xlane.f32.xlu1 %v211_v11  ;;  %v223_v23 = vsel %vm60_vm1, %v201_v20, 0.0 }
  0xda   :  { %v269_v36 = vpop.permute.xlu1 %268 }
  0xdc   :  { %215 = vadd.xlane.f32.xlu0 %v214_v16 }
  0xdd   :  { %218 = vadd.xlane.f32.xlu1 %v217_v19 }
  0xe0   :  { %221 = vadd.xlane.f32.xlu0 %v220_v21 }
  0xe1   :  { %224 = vadd.xlane.f32.xlu1 %v223_v23 }
  0xf2   :  { %282 = vbcast.lane.b32.xlu1 %v280_v27, 256 }
  0xf6   :  { %275 = vbcast.lane.b32.xlu0 %v273_v29, 256 }
 0x15d   :  { %v204_v38 = vpop.xlane.xlu0 %203 }
 0x15e   :  { %v1180_v39 = vadd.f32 %v234_v32, %v204_v38  ;;  %v210_v40 = vpop.xlane.xlu1 %209 }
 0x15f   :  { %v294_v48 = vadd.f32 %v248_v31, %v210_v40 }
 0x160   :  { %309 = vperm.xlu0 %953, %v1180_v39  }
 0x161   :  { %v207_v43 = vpop.xlane.xlu0 %206 }
 0x162   :  { %v293_v44 = vadd.f32 %v241_v30, %v207_v43  ;;  %v213_v46 = vpop.xlane.xlu1 %212 }
 0x163   :  { %v1183_v47 = vadd.f32 %v255_v34, %v213_v46 }
 0x164   :  { %312 = vperm.xlu1 %954, %v293_v44  }
 0x165   :  { %v216_v5 = vpop.xlane.xlu0 %215  ;;  %318 = vperm.xlu0 %953, %v1183_v47  }
 0x166   :  { %v219_v49 = vpop.xlane.xlu1 %218  ;;  %v296_v54 = vadd.f32 %v262_v35, %v216_v5 }
 0x167   :  { %v1186_v50 = vadd.f32 %v269_v36, %v219_v49 }
 0x168   :  { %315 = vperm.xlu1 %954, %v294_v48  }
 0x169   :  { %v222_v53 = vpop.xlane.xlu0 %221  ;;  %324 = vperm.xlu0 %953, %v1186_v50  }
 0x16a   :  { %v225_v55 = vpop.xlane.xlu1 %224 }
 0x16c   :  { %321 = vperm.xlu1 %954, %v296_v54  }
 0x16d   :  { %v276_v56 = vpop.permute.xlu0 %275 }
 0x16e   :  { %v1189_v57 = vadd.f32 %v276_v56, %v222_v53  ;;  %v283_v58 = vpop.permute.xlu1 %282 }
 0x16f   :  { %v1191_v59 = vadd.f32 %v283_v58, %v225_v55 }
 0x170   :  { %327 = vperm.xlu1 %954, %v1189_v57  }
 0x171   :  { %330 = vperm.xlu0 %953, %v1191_v59  }
 0x1db   :  { %v310_v62 = vpop.permute.xlu0 %309 }
 0x1dc   :  { %v337_v15 = vrot.slane %v310_v62, %v1197_v63 }
 0x1df   :  { %v313_v3 = vpop.permute.xlu1 %312 }
 0x1e0   :  { %v341_v11 = vrot.slane %v313_v3, %v1197_v63  ;;  %v319_v12 = vpop.permute.xlu0 %318 }
 0x1e1   :  { %v349_v1 = vrot.slane %v319_v12, %v1197_v63 }
 0x1e2   :  { %v367_v19 = vsel %vm366_vm2, %v341_v11, %v337_v15 }
 0x1e3   :  { %v316_v16 = vpop.permute.xlu1 %315 }
 0x1e4   :  { %v345_v18 = vrot.slane %v316_v16, %v1197_v63  ;;  %v325_v21 = vpop.permute.xlu0 %324 }
 0x1e5   :  { %v357_v29 = vrot.slane %v325_v21, %v1197_v63 }
 0x1e6   :  { %v369_v20 = vsel %vm368_vm3, %v345_v18, %v367_v19 }
 0x1e7   :  { %v322_v4 = vpop.permute.xlu1 %321  ;;  %v371_v23 = vsel %vm370_vm4, %v349_v1, %v369_v20 }
 0x1e8   :  { %v353_v22 = vrot.slane %v322_v4, %v1197_v63 }
 0x1ea   :  { %v373_v27 = vsel %vm372_vm5, %v353_v22, %v371_v23 }
 0x1eb   :  { %v328_v30 = vpop.permute.xlu1 %327  ;;  %v375_v35 = vsel %vm374_vm6, %v357_v29, %v373_v27 }
 0x1ec   :  { %v361_v31 = vrot.slane %v328_v30, %v1197_v63  ;;  %v331_v32 = vpop.permute.xlu0 %330 }
 0x1ed   :  { %v365_v34 = vrot.slane %v331_v32, %v1197_v63 }
 0x1ee   :  { %v377_v36 = vsel %vm376_vm7, %v361_v31, %v375_v35 }
 0x1ef   :  { %v379_v38 = vsel %vm378_vm8, %v365_v34, %v377_v36 }
 0x1f0   :  { %v382_v40 = vsel %vm381_vm9, %v379_v38, -inf }
 0x1f1   :  { %383 = vmax.xlane.f32.xlu1 %v382_v40 }
 0x27a   :  { %v384_v43 = vpop.xlane.xlu1 %383 }
 0x27b   :  { %v389_v46 = vrot.slane %v384_v43, %v1081_v9  ;;  %v393_v5 = vrot.slane %v384_v43, %v1075_v7  ;;  %v397_v49 = vrot.slane %v384_v43, %v1078_v8  ;;  %v401_v58 = vrot.slane %v384_v43, %v1094_v14 }
 0x27c   :  { %v405_v3 = vrot.slane %v384_v43, %v1084_v10  ;;  %v409_v15 = vrot.slane %v384_v43, %v1105_v17  ;;  %v417_v20 = vrot.slane %v384_v43, %v1171_v24 }
 0x27d   :  { %v426_v53 = vsub.f32 %v1180_v39, %v389_v46  ;;  %v427_v55 = vsub.f32 %v293_v44, %v393_v5  ;;  %v428_v61 = vsub.f32 %v294_v48, %v397_v49  ;;  %v429_v11 = vsub.f32 %v1183_v47, %v401_v58 }
 0x27e   :  { %v430_v16 = vsub.f32 %v296_v54, %v405_v3  ;;  %v413_v39 = vrot.slane %v384_v43, %v1174_v25  ;;  %v431_v44 = vsub.f32 %v1186_v50, %v409_v15  ;;  %v433_v54 = vsub.f32 %v1191_v59, %v417_v20 }
 0x27f   :  { %v434_v56 = vmul.f32 1.442695, %v426_v53  ;;  %v436_v62 = vmul.f32 1.442695, %v427_v55  ;;  %v438_v12 = vmul.f32 1.442695, %v428_v61 }
 0x280   :  { %v440_v18 = vmul.f32 1.442695, %v429_v11  ;;  %v442_v19 = vmul.f32 1.442695, %v430_v16  ;;  %v432_v1 = vsub.f32 %v1189_v57, %v413_v39  ;;  %v444_v47 = vmul.f32 1.442695, %v431_v44 }
 0x281   :  { %961 = vpow2.f32 %v434_v56  ;;  %v448_v50 = vmul.f32 1.442695, %v433_v54 }
 0x282   :  { %963 = vpow2.f32 %v436_v62  ;;  %v446_v21 = vmul.f32 1.442695, %v432_v1 }
 0x283   :  { %965 = vpow2.f32 %v438_v12 }
 0x284   :  { %967 = vpow2.f32 %v440_v18 }
 0x285   :  { %969 = vpow2.f32 %v442_v19 }
 0x286   :  { %971 = vpow2.f32 %v444_v47 }
 0x287   :  { %973 = vpow2.f32 %v446_v21 }
 0x288   :  { %975 = vpow2.f32 %v448_v50 }
 0x28e   :  { %v962_v48 = vpop.eup %961 }
 0x28f   :  { %459 = vperm.xlu0 %953, %v962_v48   ;;  %v964_v4 = vpop.eup %963 }
 0x290   :  { %v966_v22 = vpop.eup %965 }
 0x291   :  { %v968_v23 = vpop.eup %967 }
 0x292   :  { %v970_v27 = vpop.eup %969 }
 0x293   :  { %462 = vperm.xlu0 %953, %v964_v4   ;;  %v972_v29 = vpop.eup %971 }
 0x294   :  { %v974_v57 = vpop.eup %973 }
 0x295   :  { %v976_v30 = vpop.eup %975 }
 0x297   :  { %465 = vperm.xlu0 %953, %v966_v22  }
 0x29b   :  { %468 = vperm.xlu0 %953, %v968_v23  }
 0x29f   :  { %471 = vperm.xlu0 %953, %v970_v27  }
 0x2a3   :  { %474 = vperm.xlu0 %953, %v972_v29  }
 0x2a7   :  { %477 = vperm.xlu0 %953, %v974_v57  }
 0x2ab   :  { %480 = vperm.xlu0 %953, %v976_v30  }
 0x30a   :  { %v460_v31 = vpop.permute.xlu0 %459 }
 0x30b   :  { %v485_v43 = vrot.slane %v460_v31, %v1197_v63 }
 0x30e   :  { %v463_v32 = vpop.permute.xlu0 %462 }
 0x30f   :  { %v489_v38 = vrot.slane %v463_v32, %v1197_v63 }
 0x311   :  { %v514_v53 = vsel %vm366_vm2, %v489_v38, %v485_v43 }
 0x312   :  { %v466_v59 = vpop.permute.xlu0 %465 }
 0x313   :  { %v493_v40 = vrot.slane %v466_v59, %v1197_v63 }
 0x315   :  { %v515_v56 = vsel %vm368_vm3, %v493_v40, %v514_v53 }
 0x316   :  { %v469_v34 = vpop.permute.xlu0 %468 }
 0x317   :  { %v497_v46 = vrot.slane %v469_v34, %v1197_v63 }
 0x319   :  { %v516_v61 = vsel %vm370_vm4, %v497_v46, %v515_v56 }
 0x31a   :  { %v472_v35 = vpop.permute.xlu0 %471 }
 0x31b   :  { %v501_v5 = vrot.slane %v472_v35, %v1197_v63 }
 0x31d   :  { %v517_v62 = vsel %vm372_vm5, %v501_v5, %v516_v61 }
 0x31e   :  { %v475_v36 = vpop.permute.xlu0 %474 }
 0x31f   :  { %v505_v55 = vrot.slane %v475_v36, %v1197_v63 }
 0x321   :  { %v518_v11 = vsel %vm374_vm6, %v505_v55, %v517_v62 }
 0x322   :  { %v478_v49 = vpop.permute.xlu0 %477 }
 0x323   :  { %v509_v58 = vrot.slane %v478_v49, %v1197_v63 }
 0x325   :  { %v519_v15 = vsel %vm376_vm7, %v509_v58, %v518_v11 }
 0x326   :  { %v481_v3 = vpop.permute.xlu0 %480 }
 0x327   :  { %v513_v12 = vrot.slane %v481_v3, %v1197_v63 }
 0x329   :  { %v520_v16 = vsel %vm378_vm8, %v513_v12, %v519_v15 }
 0x32a   :  { %v522_v18 = vsel %vm381_vm9, %v520_v16, 0.0 }
 0x32b   :  { %523 = vadd.xlane.f32.xlu0 %v522_v18 }
 0x3b4   :  { %v524_v39 = vpop.xlane.xlu0 %523 }
 0x3b5   :  { %977 = vrcp.f32 %v524_v39 }
 0x3c2   :  { %v978_v44 = vpop.eup %977 }
 0x3c3   :  { %v546_v19 = vrot.slane %v978_v44, %v1084_v10  ;;  %v530_v20 = vrot.slane %v978_v44, %v1081_v9  ;;  %v534_v54 = vrot.slane %v978_v44, %v1075_v7  ;;  %v538_v50 = vrot.slane %v978_v44, %v1078_v8  ;;  %v957_v8 = vld [vmem:[%s1328_s5 + $0x8] sm:$0xff]  }
 0x3c4   :  { %v542_v32 = vrot.slane %v978_v44, %v1094_v14  ;;  %v550_v34 = vrot.slane %v978_v44, %v1105_v17  ;;  %v554_v9 = vrot.slane %v978_v44, %v1174_v25  ;;  %v558_v7 = vrot.slane %v978_v44, %v1171_v24  ;;  %933 = vmatpush3.bf16.msra.mxu1 %v957_v8  ;;  %v958_v14 = vld [vmem:[%s1328_s5] sm:$0xff]   ;;  %v959_v17 = vld [vmem:[%s1327_s4 + $0x8] sm:$0xff]  }
 0x3c5   :  { %v571_v1 = vmul.f32 %v970_v27, %v546_v19  ;;  %v567_v47 = vmul.f32 %v962_v48, %v530_v20  ;;  %v568_v21 = vmul.f32 %v964_v4, %v534_v54  ;;  %v569_v31 = vmul.f32 %v966_v22, %v538_v50  ;;  %934 = vmatprep.subr.bf16.mxu1 %v1003_v2  ;;  %v960_v24 = vld [vmem:[%s1327_s4] sm:$0xff]  }
 0x3c6   :  { %v570_v59 = vmul.f32 %v968_v23, %v542_v32  ;;  %v572_v10 = vmul.f32 %v972_v29, %v550_v34  ;;  %v573_v48 = vmul.f32 %v974_v57, %v554_v9  ;;  %v574_v4 = vmul.f32 %v976_v30, %v558_v7  ;;  %941 = vmatpush3.bf16.msra.mxu0 %v959_v17 }
 0x3c7   :  { %596 = vperm.xlu0 %953, %v571_v1   ;;  %584 = vperm.xlu1 %954, %v567_v47  }
 0x3c8   :  { %935 = vmatpush3.bf16.msra.mxu1 %v958_v14  ;;  %942 = vmatprep.subr.bf16.mxu0 %v1003_v2 }
 0x3ca   :  { %943 = vmatpush3.bf16.msra.mxu0 %v960_v24 }
 0x3cb   :  { %587 = vperm.xlu1 %954, %v568_v21   ;;  %937 = vmatmul.mubr.msk.bf16.vlgmr.msra.gmra.mxu1 %vm60_vm1, %v1072_v6 }
 0x3cf   :  { %590 = vperm.xlu1 %954, %v569_v31  }
 0x3d3   :  { %593 = vperm.xlu1 %954, %v570_v59  }
 0x3d7   :  { %599 = vperm.xlu1 %954, %v572_v10  }
 0x3db   :  { %602 = vperm.xlu1 %954, %v573_v48  }
 0x3df   :  { %605 = vperm.xlu1 %954, %v574_v4  }
 0x442   :  { %v597_v25 = vpop.permute.xlu0 %596  ;;  %v585_v22 = vpop.permute.xlu1 %584 }
 0x443   :  { %v656_v23 = vmul.f32 %v898_v33, %v585_v22  ;;  %v660_v27 = vmul.f32 %v906_v51, %v597_v25  ;;  %v610_v3 = vrot.slane %v585_v22, %v1197_v63  ;;  %v626_v42 = vrot.slane %v597_v25, %v1197_v63 }
 0x445   :  { %v664_v29 = vsel %vm60_vm1, %v656_v23, 0.0  ;;  %v692_v2 = vsel %vm60_vm1, %v660_v27, 0.0 }
 0x446   :  { %v665_v57 = vrot.slane %v664_v29, 4  ;;  %v588_v30 = vpop.permute.xlu1 %587  ;;  %v693_v43 = vrot.slane %v692_v2, 4 }
 0x447   :  { %v657_v35 = vmul.f32 %v899_v41, %v588_v30  ;;  %v614_v56 = vrot.slane %v588_v30, %v1197_v63 }
 0x448   :  { %v666_v36 = vadd.f32 %v665_v57, %v664_v29  ;;  %v694_v41 = vadd.f32 %v693_v43, %v692_v2 }
 0x449   :  { %v671_v6 = vsel %vm60_vm1, %v657_v35, 0.0  ;;  %v639_v39 = vsel %vm366_vm2, %v614_v56, %v610_v3 }
 0x44a   :  { %v672_v38 = vrot.slane %v671_v6, 4  ;;  %v591_v40 = vpop.permute.xlu1 %590  ;;  %v667_v51 = vrot.slane %v666_v36, 2 }
 0x44b   :  { %v658_v33 = vmul.f32 %v902_v37, %v591_v40  ;;  %v618_v62 = vrot.slane %v591_v40, %v1197_v63 }
 0x44c   :  { %v673_v46 = vadd.f32 %v672_v38, %v671_v6  ;;  %v668_v61 = vadd.f32 %v667_v51, %v666_v36 }
 0x44d   :  { %v678_v5 = vsel %vm60_vm1, %v658_v33, 0.0  ;;  %v640_v20 = vsel %vm368_vm3, %v618_v62, %v639_v39 }
 0x44e   :  { %v674_v49 = vrot.slane %v673_v46, 2  ;;  %v679_v53 = vrot.slane %v678_v5, 4  ;;  %v594_v55 = vpop.permute.xlu1 %593  ;;  %v669_v19 = vrot.slane %v668_v61, 1 }
 0x44f   :  { %v659_v26 = vmul.f32 %v903_v45, %v594_v55  ;;  %v622_v15 = vrot.slane %v594_v55, %v1197_v63  ;;  %v695_v45 = vrot.slane %v694_v41, 2 }
 0x450   :  { %v680_v58 = vadd.f32 %v679_v53, %v678_v5  ;;  %v675_v11 = vadd.f32 %v674_v49, %v673_v46  ;;  %v670_v7 = vadd.f32 %v669_v19, %v668_v61 }
 0x451   :  { %v685_v37 = vsel %vm60_vm1, %v659_v26, 0.0  ;;  %v641_v21 = vsel %vm370_vm4, %v622_v15, %v640_v20  ;;  %v696_v10 = vadd.f32 %v695_v45, %v694_v41 }
 0x452   :  { %v681_v12 = vrot.slane %v680_v58, 2  ;;  %v600_v16 = vpop.permute.xlu1 %599  ;;  %v686_v18 = vrot.slane %v685_v37, 4  ;;  %v676_v54 = vrot.slane %v675_v11, 1  ;;  %v642_v8 = vsel %vm372_vm5, %v626_v42, %v641_v21 }
 0x453   :  { %v661_v28 = vmul.f32 %v907_v52, %v600_v16  ;;  %v630_v50 = vrot.slane %v600_v16, %v1197_v63  ;;  %v697_v36 = vrot.slane %v696_v10, 1 }
 0x454   :  { %v682_v44 = vadd.f32 %v681_v12, %v680_v58  ;;  %v687_v1 = vadd.f32 %v686_v18, %v685_v37  ;;  %v677_v17 = vadd.f32 %v676_v54, %v675_v11 }
 0x455   :  { %v699_v47 = vsel %vm60_vm1, %v661_v28, 0.0  ;;  %v643_v24 = vsel %vm374_vm6, %v630_v50, %v642_v8  ;;  %v698_v55 = vadd.f32 %v697_v36, %v696_v10 }
 0x456   :  { %v700_v31 = vrot.slane %v699_v47, 4  ;;  %v603_v32 = vpop.permute.xlu1 %602  ;;  %v683_v52 = vrot.slane %v682_v44, 1  ;;  %v688_v59 = vrot.slane %v687_v1, 2  ;;  %v721_v33 = vpack.c.bf16 %v677_v17, %v677_v17 }
 0x457   :  { %v662_v34 = vmul.f32 %v910_v0, %v603_v32  ;;  %v634_v48 = vrot.slane %v603_v32, %v1197_v63  ;;  %v724_v12 = vpack.c.bf16 %v698_v55, %v698_v55 }
 0x458   :  { %v701_v9 = vadd.f32 %v700_v31, %v699_v47  ;;  %v689_v4 = vadd.f32 %v688_v59, %v687_v1  ;;  %v684_v27 = vadd.f32 %v683_v52, %v682_v44  ;;  %v797_v26 = vunpack.c.l.b16 %v721_v33 }
 0x459   :  { %v706_v14 = vsel %vm60_vm1, %v662_v34, 0.0  ;;  %v644_v35 = vsel %vm376_vm7, %v634_v48, %v643_v24  ;;  %v800_v19 = vunpack.c.l.b16 %v724_v12 }
 0x45a   :  { %v702_v22 = vrot.slane %v701_v9, 2  ;;  %v707_v25 = vrot.slane %v706_v14, 4  ;;  %v606_v23 = vpop.permute.xlu1 %605  ;;  %v690_v29 = vrot.slane %v689_v4, 1 }
 0x45b   :  { %v638_v0 = vrot.slane %v606_v23, %v1197_v63  ;;  %v663_v57 = vmul.f32 %v911_v13, %v606_v23  ;;  %v720_v13 = vpack.c.bf16 %v670_v7, %v670_v7  ;;  %v722_v63 = vpack.c.bf16 %v684_v27, %v684_v27 }
 0x45c   :  { %v703_v30 = vadd.f32 %v702_v22, %v701_v9  ;;  %v708_v2 = vadd.f32 %v707_v25, %v706_v14  ;;  %v691_v6 = vadd.f32 %v690_v29, %v689_v4 }
 0x45d   :  { %v645_v38 = vsel %vm378_vm8, %v638_v0, %v644_v35  ;;  %v713_v40 = vsel %vm60_vm1, %v663_v57, 0.0  ;;  %v796_v58 = vunpack.c.l.b16 %v720_v13  ;;  %v798_v61 = vunpack.c.l.b16 %v722_v63 }
 0x45e   :  { %v704_v43 = vrot.slane %v703_v30, 1  ;;  %v709_v46 = vrot.slane %v708_v2, 2  ;;  %647 = vst.msk [vmem:[%s1330_s7] sm:$0xff] %vm381_vm9, %v645_v38  ;;  %v714_v60 = vrot.slane %v713_v40, 4  ;;  %v723_v51 = vpack.c.bf16 %v691_v6, %v691_v6  ;;  %s1007_s7 = smov [#allocation2]  }
 0x45f   :  { %v804_v15 = vsel %vm366_vm2, %v797_v26, %v796_v58  ;;  %s875_s21 = sshll.u32 %s1007_s7, 4  ;;  %s876_s21 = int_to_ptr.vmem [resolvable:$true] %s875_s21 }
 0x460   :  { %v705_v5 = vadd.f32 %v704_v43, %v703_v30  ;;  %v710_v49 = vadd.f32 %v709_v46, %v708_v2  ;;  %v715_v53 = vadd.f32 %v714_v60, %v713_v40  ;;  %v799_v62 = vunpack.c.l.b16 %v723_v51  ;;  %s981_s22 = scalar_lea.vmem %s876_s21, 128  ;;  %p986_p1 = scmp.lt.s32.totalorder %s876_s21, %s876_s21 }
 0x461   :  { %v805_v28 = vsel %vm368_vm3, %v798_v61, %v804_v15  ;;  %p982_p0 = scmp.ne.s32.totalorder %s876_s21, %s981_s22  ;;  %p987_p2 = scmp.lt.s32.totalorder %s981_s22, %s981_s22 }
 0x462   :  { %v711_v41 = vrot.slane %v710_v49, 1  ;;  %v716_v56 = vrot.slane %v715_v53, 2  ;;  %v725_v37 = vpack.c.bf16 %v705_v5, %v705_v5  ;;  %v806_v45 = vsel %vm370_vm4, %v799_v62, %v805_v28 }
 0x463   :  { %v807_v47 = vsel %vm372_vm5, %v800_v19, %v806_v45  ;;  %p988_p3 = por %p987_p2, %p986_p1 }
 0x464   :  { %v712_v3 = vadd.f32 %v711_v41, %v710_v49  ;;  %v717_v11 = vadd.f32 %v716_v56, %v715_v53  ;;  %v801_v39 = vunpack.c.l.b16 %v725_v37 }
 0x465   :  { %p989_p4 = pnand %p988_p3, %p982_p0 }
 0x466   :  { %v726_v16 = vpack.c.bf16 %v712_v3, %v712_v3  ;;  %v718_v18 = vrot.slane %v717_v11, 1  ;;  %v808_v54 = vsel %vm374_vm6, %v801_v39, %v807_v47 }
 0x468   :  { %v719_v44 = vadd.f32 %v718_v18, %v717_v11  ;;  %v802_v20 = vunpack.c.l.b16 %v726_v16 }
 0x46a   :  { %v727_v1 = vpack.c.bf16 %v719_v44, %v719_v44  ;;  %v809_v50 = vsel %vm376_vm7, %v802_v20, %v808_v54 }
 0x46c   :  { %v803_v21 = vunpack.c.l.b16 %v727_v1 }
 0x46e   :  { %v810_v31 = vsel %vm378_vm8, %v803_v21, %v809_v50 }
 0x46f   :  { %v811_v32 = vpack.c.b16 %v810_v31, %v810_v31 }
 0x471   :  { %945 = vmatmul.mubr.msk.bf16.vlgmr.msra.gmra.mxu0 %vm60_vm1, %v811_v32 }
 0x48b   :  { %v782_v42 = vpop.f32.mrf.mxu1 }
 0x48d   :  { %v938_v52 = vpop.f32.mrf.mxu1 }
 0x48f   :  { %v785_v59 = vpop.f32.mrf.mxu1 }
 0x491   :  { %v939_v34 = vpop.f32.mrf.mxu1 }
 0x531   :  { %v861_v10 = vpop.f32.mrf.mxu0 }
 0x532   :  { %v862_v9 = vadd.f32 %v861_v10, %v782_v42 }
 0x533   :  { %v946_v48 = vpop.f32.mrf.mxu0 }
 0x534   :  { %979 = vtanh.f32 %v862_v9 }
 0x535   :  { %v864_v7 = vpop.f32.mrf.mxu0 }
 0x537   :  { %v947_v4 = vpop.f32.mrf.mxu0 }
 0x541   :  { %v980_v8 = vpop.eup %979 }
 0x542   :  { %868 = vst.msk [vmem:[#allocation2] sm:$0xff] %vm60_vm1, %v980_v8 }
 0x543   :  { %992 = shalt.err (!%p989_p4)
}
 0x544   :  { %878 = dma.vmem_to_hbm [thread:$0]  %s876_s21, 128, %s1329_s6, [#allocation3]  }
 0x545   :  { %1001 = dma.done.wait [#allocation3], 128  }
 0x546   :  { %1002 = vsyncadd [#allocation3], 4294967168 }
 0x547   :  { %886 = vsyncpa [#allocation3], 1 }

</bundles_post_ra>
